<compile_context>
chip_gen: v5e
topology: v5e:2x2
jax: 0.10.0
libtpu: 0.0.40
codegen_flags: <defaults>
</compile_context>

<pallas_src>
import functools

import jax
import jax.numpy as jnp
import numpy as np
from jax.experimental import pallas as pl
from jax.experimental.pallas import tpu as pltpu


# ----------------------------------------------------------------------------
# Pallas kernel: full SED head for ONE batch element per grid step.
# Layout: time on sublanes, channels/classes on lanes.
# ----------------------------------------------------------------------------
def sed_head_kernel(feat_ref, w1t_ref, b1_ref, wac_ref, bac_ref, interp_ref,
                    frame_ref, clip_ref, *, c_pad):
    feat = feat_ref[0]                                    # (Hf, T, F)
    hf = feat.shape[0]
    t_dim = feat.shape[1]

    # mean over frequency: leading-axis VPU adds over (T, F) slabs
    x = jnp.sum(feat, axis=0) * (1.0 / hf)                # (T, F)

    # max/avg pool over time (sublane axis), k=3 s=1 p=1.
    # Masks are a single (T, 1) column, broadcast over lanes.
    tpos = jax.lax.broadcasted_iota(jnp.int32, (t_dim, 1), 0)
    has_l = tpos >= 1
    has_r = tpos <= t_dim - 2
    x_l = pltpu.roll(x, shift=1, axis=0)                  # x[t-1] (wrap masked)
    x_r = pltpu.roll(x, shift=t_dim - 1, axis=0)          # x[t+1] (wrap masked)
    neg_inf = jnp.float32(-jnp.inf)
    # max_pool1d: implicit -inf padding at edges
    x1 = jnp.maximum(jnp.maximum(jnp.where(has_l, x_l, neg_inf), x),
                     jnp.where(has_r, x_r, neg_inf))
    # avg_pool1d: zero padding, count_include_pad=True -> /3
    x2 = (jnp.where(has_l, x_l, 0.0) + x + jnp.where(has_r, x_r, 0.0)) * (1.0 / 3.0)
    xs = x1 + x2                                          # (T, F)
    # dropout(p=0.5) -> identity (eval mode)

    # fc1 + ReLU
    h = jnp.maximum(
        jnp.dot(xs, w1t_ref[...], preferred_element_type=jnp.float32)
        + b1_ref[...],
        0.0)                                              # (T, F)

    # fused att/cla 1x1 convs: one (T, F) @ (F, 2*C_pad) matmul, lane-slice
    z = jnp.dot(h, wac_ref[...], preferred_element_type=jnp.float32) + bac_ref[...]
    att = jnp.tanh(z[:, :c_pad])                          # (T, C_pad)
    cla = z[:, c_pad:]                                    # attn_activation='linear'

    # softmax over time (sublane axis).  tanh bounds |att| <= 1 so exp is safe
    # without max subtraction.  Reciprocal on the small (1, C_pad) denominator.
    e = jnp.exp(att)                                      # (T, C_pad)
    denom = jnp.sum(e, axis=0, keepdims=True)             # (1, C_pad)
    norm_att = e * pl.reciprocal(denom, approx=False)

    # clipwise output: sum over time of attention-weighted scores
    clip_ref[0] = jnp.sum(norm_att * cla, axis=0, keepdims=True)   # (1, C_pad)

    # framewise output: (P, T) @ (T, C_pad) -> lane-dense (P, C_pad)
    frame_ref[0] = jnp.dot(interp_ref[...], cla, preferred_element_type=jnp.float32)


def run_sed_head(feat, params, interp_matrix):
    """feat: (B, F, Hf, T) backbone features (NCHW). Returns (framewise, clipwise)."""
    b_dim, f_dim, hf_dim, t_dim = feat.shape
    n_frames = interp_matrix.shape[0]
    c_dim = params["watt"].shape[0]
    c_pad = ((c_dim + 127) // 128) * 128                  # lane-dense class dim

    # (B, F, Hf, T) -> (B, Hf, T, F): freq leading (reduce axis), time on
    # sublanes, channels on lanes.
    feat_t = jnp.transpose(feat, (0, 2, 3, 1))

    # fc1 weights as (F_in, F_out), bias as a row
    w1t = params["w1"].T
    b1r = params["b1"].reshape(1, f_dim)

    # stack att/cla weights (zero-padded to C_pad classes) -> single matmul
    def pad_c(w):
        return jnp.pad(w, ((0, c_pad - c_dim), (0, 0)))
    w_ac_t = jnp.concatenate([pad_c(params["watt"]), pad_c(params["wcla"])],
                             axis=0).T                    # (F, 2*C_pad)
    b_ac_r = jnp.concatenate([
        jnp.pad(params["batt"].reshape(-1), (0, c_pad - c_dim)),
        jnp.pad(params["bcla"].reshape(-1), (0, c_pad - c_dim)),
    ]).reshape(1, 2 * c_pad)

    interp = interp_matrix.astype(jnp.float32)            # (P, T), shared

    kernel = functools.partial(sed_head_kernel, c_pad=c_pad)

    frame_o, clip_o = pl.pallas_call(
        kernel,
        out_shape=(jax.ShapeDtypeStruct((b_dim, n_frames, c_pad), jnp.float32),
                   jax.ShapeDtypeStruct((b_dim, 1, c_pad), jnp.float32)),
        grid=(b_dim,),
        in_specs=[
            # per-batch feature tile (streamed / double-buffered by Pallas)
            pl.BlockSpec((1, hf_dim, t_dim, f_dim), lambda b: (b, 0, 0, 0)),
            # weights / biases / interp matrix: constant index_map -> resident
            pl.BlockSpec((f_dim, f_dim), lambda b: (0, 0)),
            pl.BlockSpec((1, f_dim), lambda b: (0, 0)),
            pl.BlockSpec((f_dim, 2 * c_pad), lambda b: (0, 0)),
            pl.BlockSpec((1, 2 * c_pad), lambda b: (0, 0)),
            pl.BlockSpec((n_frames, t_dim), lambda b: (0, 0)),
        ],
        out_specs=(pl.BlockSpec((1, n_frames, c_pad), lambda b: (b, 0, 0)),
                   pl.BlockSpec((1, 1, c_pad), lambda b: (b, 0, 0))),
        compiler_params=pltpu.CompilerParams(
            dimension_semantics=("parallel",)),
    )(feat_t, w1t, b1r, w_ac_t, b_ac_r, interp)

    framewise = frame_o[:, :, :c_dim]                     # (B, P, C)
    clipwise = clip_o[:, 0, :c_dim]                       # (B, C)
    return framewise, clipwise


# ----------------------------------------------------------------------------
# Plain-JAX glue.
# ----------------------------------------------------------------------------
def build_interp_matrix(t_dim, ratio, frames_num, dtype=jnp.float32):
    """M (frames_num, T): repeat-by-ratio followed by bilinear (align_corners=True)."""
    length = t_dim * ratio
    j = jnp.arange(frames_num, dtype=jnp.float32)
    if frames_num > 1:
        pos = j * (length - 1) / (frames_num - 1)
    else:
        pos = jnp.zeros_like(j)
    i0 = jnp.floor(pos).astype(jnp.int32)
    i1 = jnp.minimum(i0 + 1, length - 1)
    w = pos - i0.astype(jnp.float32)
    t0 = i0 // ratio
    t1 = i1 // ratio
    m = jnp.zeros((frames_num, t_dim), dtype)
    m = m.at[jnp.arange(frames_num), t0].add((1.0 - w).astype(dtype))
    m = m.at[jnp.arange(frames_num), t1].add(w.astype(dtype))
    return m


def synthetic_backbone(x, kernel, bias):
    """Stand-in backbone: 3x3 conv stride 2 + ReLU (NCHW)."""
    y = jax.lax.conv_general_dilated(
        x, kernel, window_strides=(2, 2), padding=((1, 1), (1, 1)),
        dimension_numbers=("NCHW", "OIHW", "NCHW"))
    return jax.nn.relu(y + bias[None, :, None, None])


def xavier_uniform(key, shape, fan_in, fan_out):
    limit = float(np.sqrt(6.0 / (fan_in + fan_out)))
    return jax.random.uniform(key, shape, jnp.float32, -limit, limit)


def reference_sed(feat, params, ratio, frames_num):
    """Pure-JAX reference mirroring the PyTorch forward (eval mode)."""
    _, _, _, t_dim = feat.shape
    x = jnp.mean(feat, axis=2)                                    # (B, F, T)
    xm = jnp.pad(x, ((0, 0), (0, 0), (1, 1)), constant_values=-jnp.inf)
    x1 = jnp.maximum(jnp.maximum(xm[..., :t_dim], xm[..., 1:t_dim + 1]),
                     xm[..., 2:t_dim + 2])
    xa = jnp.pad(x, ((0, 0), (0, 0), (1, 1)))
    x2 = (xa[..., :t_dim] + xa[..., 1:t_dim + 1] + xa[..., 2:t_dim + 2]) / 3.0
    xs = x1 + x2
    h = jax.nn.relu(jnp.einsum("oi,bit->bot", params["w1"], xs) + params["b1"][None])
    att = jnp.tanh(jnp.einsum("cf,bft->bct", params["watt"], h) + params["batt"][None])
    norm_att = jax.nn.softmax(att, axis=-1)
    cla = jnp.einsum("cf,bft->bct", params["wcla"], h) + params["bcla"][None]
    clip = jnp.sum(norm_att * cla, axis=2)
    seg = jnp.transpose(cla, (0, 2, 1))                           # (B, T, C)
    up = jnp.repeat(seg, ratio, axis=1)                           # (B, T*ratio, C)
    length = t_dim * ratio
    pos = jnp.arange(frames_num) * (length - 1) / (frames_num - 1)
    i0 = jnp.floor(pos).astype(jnp.int32)
    i1 = jnp.minimum(i0 + 1, length - 1)
    w = (pos - i0).astype(jnp.float32)
    fw = (1.0 - w)[None, :, None] * up[:, i0, :] + w[None, :, None] * up[:, i1, :]
    return fw, clip


if __name__ == "__main__":
    B, C_IN, H, W = 2, 4, 16, 16          # input spectrogram (NCHW); frames_num = W
    NUM_FEATURES = 32
    NUM_CLASSES = 16
    RATIO = 30
    FRAMES_NUM = W

    key = jax.random.PRNGKey(0)
    k_x, k_bk, k_fc1, k_att, k_cla = jax.random.split(key, 5)

    x = jax.random.normal(k_x, (B, C_IN, H, W), jnp.float32)

    # synthetic backbone params (stand-in for an external backbone)
    bk_kernel = 0.1 * jax.random.normal(k_bk, (NUM_FEATURES, C_IN, 3, 3), jnp.float32)
    bk_bias = jnp.zeros((NUM_FEATURES,), jnp.float32)

    # SED head params (xavier_uniform weights, zero biases, as in init_layer)
    params = {
        "w1": xavier_uniform(k_fc1, (NUM_FEATURES, NUM_FEATURES),
                             NUM_FEATURES, NUM_FEATURES),
        "b1": jnp.zeros((NUM_FEATURES, 1), jnp.float32),
        "watt": xavier_uniform(k_att, (NUM_CLASSES, NUM_FEATURES),
                               NUM_FEATURES, NUM_CLASSES),
        "batt": jnp.zeros((NUM_CLASSES, 1), jnp.float32),
        "wcla": xavier_uniform(k_cla, (NUM_CLASSES, NUM_FEATURES),
                               NUM_FEATURES, NUM_CLASSES),
        "bcla": jnp.zeros((NUM_CLASSES, 1), jnp.float32),
    }

    feat = synthetic_backbone(x, bk_kernel, bk_bias)     # (B, 32, 8, 8)
    t_dim = feat.shape[3]
    interp_matrix = build_interp_matrix(t_dim, RATIO, FRAMES_NUM)

    framewise, clipwise = run_sed_head(feat, params, interp_matrix)
    framewise = jax.block_until_ready(framewise)
    clipwise = jax.block_until_ready(clipwise)

    fw_ref, clip_ref = reference_sed(feat, params, RATIO, FRAMES_NUM)
    np.testing.assert_allclose(np.asarray(framewise), np.asarray(fw_ref),
                               rtol=1e-4, atol=1e-4)
    np.testing.assert_allclose(np.asarray(clipwise), np.asarray(clip_ref),
                               rtol=1e-4, atol=1e-4)

    assert framewise.shape == (B, FRAMES_NUM, NUM_CLASSES)
    assert clipwise.shape == (B, NUM_CLASSES)
    print("KERNEL_OK")
</pallas_src>

<mosaic_0001>
module attributes {stable_mosaic.version = 11 : i64} {
  func.func @sed_head_kernel(%arg0: i32, %arg1: memref<1x8x8x32xf32, #tpu.memory_space<vmem>>, %arg2: memref<32x32xf32, #tpu.memory_space<vmem>>, %arg3: memref<1x32xf32, #tpu.memory_space<vmem>>, %arg4: memref<32x256xf32, #tpu.memory_space<vmem>>, %arg5: memref<1x256xf32, #tpu.memory_space<vmem>>, %arg6: memref<16x8xf32, #tpu.memory_space<vmem>>, %arg7: memref<1x16x128xf32, #tpu.memory_space<vmem>>, %arg8: memref<1x1x128xf32, #tpu.memory_space<vmem>>) attributes {dimension_semantics = [#tpu.dimension_semantics<parallel>], iteration_bounds = array<i64: 2>, scalar_prefetch = 0 : i64, scratch_operands = 0 : i64, tpu.core_type = #tpu.core_type<tc>, window_params = [{transform_indices = @transform_0, window_bounds = array<i64: 1, 8, 8, 32>}, {pipeline_mode = #tpu.pipeline_mode<synchronous>, transform_indices = @transform_1, window_bounds = array<i64: 32, 32>}, {pipeline_mode = #tpu.pipeline_mode<synchronous>, transform_indices = @transform_2, window_bounds = array<i64: 1, 32>}, {pipeline_mode = #tpu.pipeline_mode<synchronous>, transform_indices = @transform_3, window_bounds = array<i64: 32, 256>}, {pipeline_mode = #tpu.pipeline_mode<synchronous>, transform_indices = @transform_4, window_bounds = array<i64: 1, 256>}, {pipeline_mode = #tpu.pipeline_mode<synchronous>, transform_indices = @transform_5, window_bounds = array<i64: 16, 8>}, {transform_indices = @transform_6, window_bounds = array<i64: 1, 16, 128>}, {transform_indices = @transform_7, window_bounds = array<i64: 1, 1, 128>}]} {
    %c0 = arith.constant 0 : index
    %c0_0 = arith.constant 0 : index
    %c0_1 = arith.constant 0 : index
    %c0_2 = arith.constant 0 : index
    %0 = vector.load %arg1[%c0, %c0_0, %c0_1, %c0_2] : memref<1x8x8x32xf32, #tpu.memory_space<vmem>>, vector<1x8x8x32xf32>
    %1 = vector.shape_cast %0 : vector<1x8x8x32xf32> to vector<8x8x32xf32>
    %cst = arith.constant dense<0.000000e+00> : vector<8x32xf32>
    %2 = vector.multi_reduction <add>, %1, %cst [0] : vector<8x8x32xf32> to vector<8x32xf32>
    %cst_3 = arith.constant 1.250000e-01 : f32
    %3 = vector.broadcast %cst_3 : f32 to vector<8x32xf32>
    %4 = arith.mulf %2, %3 : vector<8x32xf32>
    %5 = tpu.iota {dimensions = array<i32: 0>} : vector<8x1xi32>
    %c1_i32 = arith.constant 1 : i32
    %6 = vector.broadcast %c1_i32 : i32 to vector<8x1xi32>
    %7 = arith.cmpi sge, %5, %6 : vector<8x1xi32>
    %c6_i32 = arith.constant 6 : i32
    %8 = vector.broadcast %c6_i32 : i32 to vector<8x1xi32>
    %9 = arith.cmpi sle, %5, %8 : vector<8x1xi32>
    %c1_i32_4 = arith.constant 1 : i32
    %10 = tpu.dynamic_rotate %4 by %c1_i32_4 dim 0 : vector<8x32xf32>, i32 -> vector<8x32xf32>
    %c7_i32 = arith.constant 7 : i32
    %11 = tpu.dynamic_rotate %4 by %c7_i32 dim 0 : vector<8x32xf32>, i32 -> vector<8x32xf32>
    %cst_5 = arith.constant 0xFF800000 : f32
    %12 = vector.shape_cast %7 : vector<8x1xi1> to vector<8x1xi1>
    %13 = vector.broadcast %12 : vector<8x1xi1> to vector<8x32xi1>
    %14 = vector.broadcast %cst_5 : f32 to vector<8x32xf32>
    %15 = arith.select %13, %10, %14 : vector<8x32xi1>, vector<8x32xf32>
    %16 = arith.maximumf %15, %4 : vector<8x32xf32>
    %cst_6 = arith.constant 0xFF800000 : f32
    %17 = vector.shape_cast %9 : vector<8x1xi1> to vector<8x1xi1>
    %18 = vector.broadcast %17 : vector<8x1xi1> to vector<8x32xi1>
    %19 = vector.broadcast %cst_6 : f32 to vector<8x32xf32>
    %20 = arith.select %18, %11, %19 : vector<8x32xi1>, vector<8x32xf32>
    %21 = arith.maximumf %16, %20 : vector<8x32xf32>
    %cst_7 = arith.constant 0.000000e+00 : f32
    %22 = vector.shape_cast %7 : vector<8x1xi1> to vector<8x1xi1>
    %23 = vector.broadcast %22 : vector<8x1xi1> to vector<8x32xi1>
    %24 = vector.broadcast %cst_7 : f32 to vector<8x32xf32>
    %25 = arith.select %23, %10, %24 : vector<8x32xi1>, vector<8x32xf32>
    %26 = arith.addf %25, %4 : vector<8x32xf32>
    %cst_8 = arith.constant 0.000000e+00 : f32
    %27 = vector.shape_cast %9 : vector<8x1xi1> to vector<8x1xi1>
    %28 = vector.broadcast %27 : vector<8x1xi1> to vector<8x32xi1>
    %29 = vector.broadcast %cst_8 : f32 to vector<8x32xf32>
    %30 = arith.select %28, %11, %29 : vector<8x32xi1>, vector<8x32xf32>
    %31 = arith.addf %26, %30 : vector<8x32xf32>
    %cst_9 = arith.constant 0.333333343 : f32
    %32 = vector.broadcast %cst_9 : f32 to vector<8x32xf32>
    %33 = arith.mulf %31, %32 : vector<8x32xf32>
    %34 = arith.addf %21, %33 : vector<8x32xf32>
    %c0_10 = arith.constant 0 : index
    %c0_11 = arith.constant 0 : index
    %35 = vector.load %arg2[%c0_10, %c0_11] : memref<32x32xf32, #tpu.memory_space<vmem>>, vector<32x32xf32>
    %cst_12 = arith.constant dense<0.000000e+00> : vector<8x32xf32>
    %36 = tpu.matmul %34, %35, %cst_12 {dimension_numbers = #tpu.dot_dimension_numbers<[1], [0], [0], [1], [0, 0, 1, 1], [], []>} : vector<8x32xf32>, vector<32x32xf32>, vector<8x32xf32> -> vector<8x32xf32>
    %c0_13 = arith.constant 0 : index
    %c0_14 = arith.constant 0 : index
    %37 = vector.load %arg3[%c0_13, %c0_14] : memref<1x32xf32, #tpu.memory_space<vmem>>, vector<1x32xf32>
    %38 = vector.broadcast %37 : vector<1x32xf32> to vector<8x32xf32>
    %39 = arith.addf %36, %38 : vector<8x32xf32>
    %cst_15 = arith.constant 0.000000e+00 : f32
    %40 = vector.broadcast %cst_15 : f32 to vector<8x32xf32>
    %41 = arith.maximumf %39, %40 : vector<8x32xf32>
    %c0_16 = arith.constant 0 : index
    %c0_17 = arith.constant 0 : index
    %42 = vector.load %arg4[%c0_16, %c0_17] : memref<32x256xf32, #tpu.memory_space<vmem>>, vector<32x256xf32>
    %cst_18 = arith.constant dense<0.000000e+00> : vector<8x256xf32>
    %43 = tpu.matmul %41, %42, %cst_18 {dimension_numbers = #tpu.dot_dimension_numbers<[1], [0], [0], [1], [0, 0, 1, 1], [], []>} : vector<8x32xf32>, vector<32x256xf32>, vector<8x256xf32> -> vector<8x256xf32>
    %c0_19 = arith.constant 0 : index
    %c0_20 = arith.constant 0 : index
    %44 = vector.load %arg5[%c0_19, %c0_20] : memref<1x256xf32, #tpu.memory_space<vmem>>, vector<1x256xf32>
    %45 = vector.broadcast %44 : vector<1x256xf32> to vector<8x256xf32>
    %46 = arith.addf %43, %45 : vector<8x256xf32>
    %47 = vector.extract_strided_slice %46 {offsets = [0, 0], sizes = [8, 128], strides = [1, 1]} : vector<8x256xf32> to vector<8x128xf32>
    %48 = math.tanh %47 : vector<8x128xf32>
    %49 = vector.extract_strided_slice %46 {offsets = [0, 128], sizes = [8, 128], strides = [1, 1]} : vector<8x256xf32> to vector<8x128xf32>
    %50 = math.exp %48 : vector<8x128xf32>
    %cst_21 = arith.constant dense<0.000000e+00> : vector<128xf32>
    %51 = vector.multi_reduction <add>, %50, %cst_21 [0] : vector<8x128xf32> to vector<128xf32>
    %52 = vector.shape_cast %51 : vector<128xf32> to vector<1x128xf32>
    %53 = tpu.reciprocal %52 : vector<1x128xf32> -> vector<1x128xf32>
    %54 = vector.broadcast %53 : vector<1x128xf32> to vector<8x128xf32>
    %55 = arith.mulf %50, %54 : vector<8x128xf32>
    %56 = arith.mulf %55, %49 : vector<8x128xf32>
    %cst_22 = arith.constant dense<0.000000e+00> : vector<128xf32>
    %57 = vector.multi_reduction <add>, %56, %cst_22 [0] : vector<8x128xf32> to vector<128xf32>
    %58 = vector.shape_cast %57 : vector<128xf32> to vector<1x128xf32>
    %c0_23 = arith.constant 0 : index
    %c0_24 = arith.constant 0 : index
    %c0_25 = arith.constant 0 : index
    %59 = vector.load %arg8[%c0_23, %c0_24, %c0_25] : memref<1x1x128xf32, #tpu.memory_space<vmem>>, vector<1x1x128xf32>
    %60 = vector.shape_cast %59 : vector<1x1x128xf32> to vector<1x128xf32>
    %61 = vector.shape_cast %58 : vector<1x128xf32> to vector<1x1x128xf32>
    tpu.vector_store %arg8[%c0_23, %c0_24, %c0_25], %61 {strides = array<i32>} : memref<1x1x128xf32, #tpu.memory_space<vmem>>, vector<1x1x128xf32>,
    %c0_26 = arith.constant 0 : index
    %c0_27 = arith.constant 0 : index
    %62 = vector.load %arg6[%c0_26, %c0_27] : memref<16x8xf32, #tpu.memory_space<vmem>>, vector<16x8xf32>
    %cst_28 = arith.constant dense<0.000000e+00> : vector<16x128xf32>
    %63 = tpu.matmul %62, %49, %cst_28 {dimension_numbers = #tpu.dot_dimension_numbers<[1], [0], [0], [1], [0, 0, 1, 1], [], []>} : vector<16x8xf32>, vector<8x128xf32>, vector<16x128xf32> -> vector<16x128xf32>
    %c0_29 = arith.constant 0 : index
    %c0_30 = arith.constant 0 : index
    %c0_31 = arith.constant 0 : index
    %64 = vector.load %arg7[%c0_29, %c0_30, %c0_31] : memref<1x16x128xf32, #tpu.memory_space<vmem>>, vector<1x16x128xf32>
    %65 = vector.shape_cast %64 : vector<1x16x128xf32> to vector<16x128xf32>
    %66 = vector.shape_cast %63 : vector<16x128xf32> to vector<1x16x128xf32>
    tpu.vector_store %arg7[%c0_29, %c0_30, %c0_31], %66 {strides = array<i32>} : memref<1x16x128xf32, #tpu.memory_space<vmem>>, vector<1x16x128xf32>,
    return
  }
  func.func @transform_0(%arg0: i32) -> (i32, i32, i32, i32) {
    %c0_i32 = arith.constant 0 : i32
    %c0_i32_0 = arith.constant 0 : i32
    %c0_i32_1 = arith.constant 0 : i32
    %c0_i32_2 = arith.constant 0 : i32
    return %arg0, %c0_i32, %c0_i32_0, %c0_i32_1 : i32, i32, i32, i32
  }
  func.func @transform_1(%arg0: i32) -> (i32, i32) {
    %c0_i32 = arith.constant 0 : i32
    %c0_i32_0 = arith.constant 0 : i32
    %c0_i32_1 = arith.constant 0 : i32
    return %c0_i32, %c0_i32_0 : i32, i32
  }
  func.func @transform_2(%arg0: i32) -> (i32, i32) {
    %c0_i32 = arith.constant 0 : i32
    %c0_i32_0 = arith.constant 0 : i32
    %c0_i32_1 = arith.constant 0 : i32
    return %c0_i32, %c0_i32_0 : i32, i32
  }
  func.func @transform_3(%arg0: i32) -> (i32, i32) {
    %c0_i32 = arith.constant 0 : i32
    %c0_i32_0 = arith.constant 0 : i32
    %c0_i32_1 = arith.constant 0 : i32
    return %c0_i32, %c0_i32_0 : i32, i32
  }
  func.func @transform_4(%arg0: i32) -> (i32, i32) {
    %c0_i32 = arith.constant 0 : i32
    %c0_i32_0 = arith.constant 0 : i32
    %c0_i32_1 = arith.constant 0 : i32
    return %c0_i32, %c0_i32_0 : i32, i32
  }
  func.func @transform_5(%arg0: i32) -> (i32, i32) {
    %c0_i32 = arith.constant 0 : i32
    %c0_i32_0 = arith.constant 0 : i32
    %c0_i32_1 = arith.constant 0 : i32
    return %c0_i32, %c0_i32_0 : i32, i32
  }
  func.func @transform_6(%arg0: i32) -> (i32, i32, i32) {
    %c0_i32 = arith.constant 0 : i32
    %c0_i32_0 = arith.constant 0 : i32
    %c0_i32_1 = arith.constant 0 : i32
    return %arg0, %c0_i32, %c0_i32_0 : i32, i32, i32
  }
  func.func @transform_7(%arg0: i32) -> (i32, i32, i32) {
    %c0_i32 = arith.constant 0 : i32
    %c0_i32_0 = arith.constant 0 : i32
    %c0_i32_1 = arith.constant 0 : i32
    return %arg0, %c0_i32, %c0_i32_0 : i32, i32, i32
  }
}

</mosaic_0001>

<bundles_post_ra>
// kernel: tpu_custom_call.1
= control target key start
LH: loop header
LB: loop body
LE: loop exit
PB: predicated region body
PF: predicated region fallthrough
CT: control target
= control target key end

     0   :  { %s1244_s0 = inlined_call_operand.hbm [shape: f32[2,8,8,32], index: 0, kind: input, shape index: {}]   ;;  %s1245_s1 = inlined_call_operand.hbm [shape: f32[32,32], index: 1, kind: input, shape index: {}]   ;;  %s1246_s2 = inlined_call_operand.vmem [shape: f32[1,32], index: 2, kind: input, shape index: {}]   ;;  %s1247_s3 = inlined_call_operand.hbm [shape: f32[32,256], index: 3, kind: input, shape index: {}]   ;;  %s1248_s4 = inlined_call_operand.vmem [shape: f32[1,256], index: 4, kind: input, shape index: {}]   ;;  %s1249_s5 = inlined_call_operand.vmem [shape: f32[16,8], index: 5, kind: input, shape index: {}]   ;;  %s1250_s6 = inlined_call_operand.hbm [shape: f32[2,16,128], index: 6, kind: output, shape index: {0}]   ;;  %s1251_s7 = inlined_call_operand.hbm [shape: f32[2,1,128], index: 7, kind: output, shape index: {1}]  }
   0x1   :  { %1254 = sst [smem:[#allocation15_spill]] %s1245_s1 }
   0x2   :  { %13 = vsyncpa [#allocation3], 0 }
   0x3   :  { %15 = vsyncpa [#allocation3 + $0x1], 0 }
   0x4   :  { %16 = vsyncpa [#allocation6], 0 }
   0x5   :  { %17 = vsyncpa [#allocation4], 0 }
   0x6   :  { %19 = vsyncpa [#allocation4 + $0x1], 0 }
   0x7   :  { %20 = vsyncpa [#allocation10], 0 }
   0x8   :  { %22 = vsyncpa [#allocation10 + $0x1], 0  ;;  %s1047_s24 = smov 0   ;;  %s1049_s25 = smov 0  }
   0x9   :  { %s1051_s26 = smov 0   ;;  %s1053_s27 = smov 0  }
   0xa LB: > { %s1068_s28 = sadd.s32 4294967295, %s997_s27   ;;  %s695_s29 = sadd.s32 4294967294, %s997_s27   ;;  %s997_s27 = sphi %s1053_s27, %s1267_s27   ;;  %s993_s26 = sphi %s1051_s26, %s1266_s26   ;;  %s989_s25 = sphi %s1049_s25, %s1265_s25   ;;  %s985_s24 = sphi %s1047_s24, %s1264_s24  }
   0xb   : > { %p48_p0 = scmp.ne.s32.totalorder %s989_s25, %s985_s24  ;;  %p49_p1 = scmp.eq.s32.totalorder %s1068_s28, 0 }
   0xc   : > { %p177_p2 = scmp.eq.s32.totalorder %s1068_s28, 1  ;;  %p183_p3 = scmp.eq.s32.totalorder %s695_s29, 1 }
   0xd   : > { %p1077_p4 = por %p49_p1, %p48_p0  ;;  %p696_p5 = scmp.ge.s32.totalorder %s997_s27, 1 }
   0xe   : > { %p1082_p6 = por %p183_p3, %p48_p0  ;;  %p216_p7 = scmp.lt.s32.totalorder %s997_s27, 3 }
   0xf   : > { %s1257_s1 = sld [smem:[#allocation15_spill]]  ;;  %s999_s13 = smov [#allocation5]  }
  0x10   : > { %p1090_p8 = pnand %p696_p5, %p216_p7  ;;  %s229_s14 = sshll.u32 %s999_s13, 4  ;;  %s230_s14 = int_to_ptr.vmem [resolvable:$true] %s229_s14 }
  0x11   : > { %s244_s17 = sshll.u32 %s1247_s3, 4  ;;  %s1252_s18 = smov 128   ;;  %s245_s17 = int_to_ptr.hbm [resolvable:$true] %s244_s17 }
  0x12   : > { %p734_p9 = pneg %p1090_p8  ;;  %s1253_s19 = smov 8  }
  0x13   : > { %s1002_s20 = smov [#allocation7]   ;;  %s1003_s22 = smov 256  }
  0x14   : > { %p735_p10 = pnand %p734_p9, %p49_p1  ;;  %s246_s21 = sshll.u32 %s1002_s20, 4  ;;  %s247_s21 = int_to_ptr.vmem [resolvable:$true] %s246_s21 }
  0x15   : > { %s227_s11 = sshll.u32 %s1257_s1, 4  ;;  %s1004_s23 = smov 16   ;;  %s228_s11 = int_to_ptr.hbm [resolvable:$true] %s227_s11 }
  0x16   : > { %737 = dma.hbm_to_vmem [thread:$0]  (!%p735_p10), %s228_s11, 512, %s230_s14, [#allocation6], %s1252_s18, %s1252_s18, %s1253_s19  }
  0x17   : > { %740 = dma.hbm_to_vmem [thread:$0]  (!%p735_p10), %s245_s17, 1024, %s247_s21, [#allocation6], %s1003_s22, %s1003_s22, %s1004_s23  }
  0x18   : > { %s1106_s29 = sadd.s32 1, %s997_s27   ;;  %s35_s10 = sadd.s32 1, %s993_s26 }
  0x19   : > { %s32_s9 = ssub.s32 %s997_s27, %s1106_s29  ;;  %p42_p13 = scmp.ne.s32.totalorder %s993_s26, %s989_s25 }
  0x1a   : > { %p33_p12 = scmp.eq.s32.totalorder %s32_s9, 0  ;;  %p43_p0 = scmp.eq.s32.totalorder %s997_s27, 0 }
  0x1b   : > { %p1119_p5 = por %p177_p2, %p42_p13  ;;  %p754_p7 = scmp.lt.s32.totalorder %s997_s27, 2 }
  0x1c   : > { %s1115_s13 = scalar_select %p33_p12, %s993_s26, %s35_s10  }
  0x1d   : > { %p44_p3 = por %p43_p0, %p42_p13  ;;  %s266_s14 = sand.u32 1, %s993_s26  }
  0x1e   : > { %s700_s15 = sshll.u32 %s266_s14, 6  ;;  %s718_s16 = sshll.u32 %s997_s27, 6 }
  0x1f   : > { %s275_s21 = scalar_lea.hbm %s1244_s0, %s718_s16  ;;  %s270_s22 = scalar_lea.vmem [#allocation2], %s700_s15 }
  0x20   : > { %s278_s23 = sshll.u32 %s270_s22, 4  ;;  %s276_s9 = sshll.u32 %s275_s21, 4  ;;  %s279_s23 = int_to_ptr.vmem [resolvable:$true] %s278_s23  ;;  %s277_s9 = int_to_ptr.hbm [resolvable:$true] %s276_s9 }
  0x21   : > { %p1129_p9 = pnand %p754_p7, %p44_p3  ;;  %s267_s18 = scalar_lea.sflag [#allocation3], %s266_s14 }
  0x22   : > { %s865_s19 = sshra.s32 %s277_s9, 4  ;;  %s872_s17 = scalar_lea.hbm %s1244_s0, 128  ;;  %s866_s19 = int_to_ptr.hbm [resolvable:$true] %s865_s19 }
  0x23   : > { %s867_s1 = scalar_lea.hbm %s866_s19, 64  ;;  %p869_p10 = pneg %p1129_p9 }
  0x24   : > { %p868_p2 = scmp.ne.s32.totalorder %s866_s19, %s867_s1  ;;  %p873_p0 = scmp.lt.s32.totalorder %s866_s19, %s1244_s0 }
  0x25   : > { %p874_p3 = scmp.lt.s32.totalorder %s872_s17, %s867_s1 }
  0x26   : > { %p870_p12 = pnand %p869_p10, %p868_p2 }
  0x27   : > { %p875_p7 = por %p874_p3, %p873_p0 }
  0x28   : > { %p871_p13 = pneg %p870_p12 }
  0x2a   : > { %p876_p11 = pnand %p875_p7, %p871_p13 }
  0x2c   : > { %879 = shalt.err (!%p876_p11)
}
  0x2d   : > { %s1261_s14 = smov 8   ;;  %s1262_s22 = smov 128  }
  0x2e   : > { %744 = dma.hbm_to_vmem [thread:$0]  (!%p1129_p9), %s277_s9, 1024, %s279_s23, %s267_s18, %s1262_s22, %s1262_s22, %s1261_s14  }
  0x2f   : > { %290 = sbr.rel (%p1090_p8) target bundleno = 494 (0x1ee), region = 44  ;;  %s1149_s16 = sand.u32 (!%p1090_p8), 1, %s989_s25  }
  0x30   : > { %s704_s19 = sshll.u32 (!%p1090_p8), %s1149_s16, 6  ;;  %s293_s1 = scalar_lea.sflag (!%p1090_p8), [#allocation3], %s1149_s16 }
  0x31   : > { %s1153_s15 = scalar_lea.vmem (!%p1090_p8), [#allocation2], %s704_s19 }
  0x34   : > { %968 = dma.done.wait (%p1077_p4), %s293_s1, 1024  }
  0x35   : > { %970 = vsyncadd (%p1077_p4), %s293_s1, 4294966272 }
  0x36   : > { %972 = dma.done.wait (%p49_p1), [#allocation6], 1536  }
  0x37   : > { %974 = vsyncadd (%p49_p1), [#allocation6], 4294965760  ;;  %vm350_vm0 = vcmask 261120   ;;  %v390_v0 = vld [vmem:[#allocation5 + $0x18] sm:$0xff]  ;;  %v389_v1 = vld [vmem:[#allocation5 + $0x10] sm:$0xff]  ;;  %v367_v25 = vlaneseq  ;;  %vm510_vm3 = vcmask 64512   ;;  %s573_s22 = scalar_lea.hbm %s1251_s7, %s1068_s28 }
  0x38   : > { %410 = vmatpush.msra.mxu0 %v390_v0  ;;  %v342_v2 = vld [vmem:[%s1153_s15] sm:$0xff]  ;;  %v343_v3 = vld [vmem:[%s1153_s15 + $0x8] sm:$0xff]  ;;  %v344_v5 = vld [vmem:[%s1153_s15 + $0x10] sm:$0xff]  ;;  %s341_s19 = scalar_lea.vmem [#allocation9], %s1149_s16  ;;  %s548_s30 = scalar_lea.sflag [#allocation10], %s1149_s16 }
  0x39   : > { %v388_v4 = vld [vmem:[#allocation5 + $0x8] sm:$0xff]  ;;  %v345_v6 = vld [vmem:[%s1153_s15 + $0x18] sm:$0xff]  ;;  %v351_v7 = vsel %vm350_vm0, %v342_v2, 0.0  ;;  %v352_v8 = vsel %vm350_vm0, %v343_v3, 0.0  ;;  %v346_v9 = vld [vmem:[%s1153_s15 + $0x20] sm:$0xff]  ;;  %v354_v11 = vsel %vm350_vm0, %v344_v5, 0.0 }
  0x3a   : > { %411 = vmatpush.msra.mxu0 %v389_v1  ;;  %v353_v10 = vadd.f32 %v352_v8, %v351_v7  ;;  %v387_v12 = vld [vmem:[#allocation5] sm:$0xff]  ;;  %v356_v13 = vsel %vm350_vm0, %v345_v6, 0.0  ;;  %v425_v14 = vld [vmem:[#allocation7 + $0x30] sm:$0xff]  ;;  %v426_v15 = vld [vmem:[#allocation7 + $0x38] sm:$0xff]  ;;  %v358_v18 = vsel %vm350_vm0, %v346_v9, 0.0  ;;  %v368_v29 = vshrl.u32 %v367_v25, 7 }
  0x3b   : > { %v347_v16 = vld [vmem:[%s1153_s15 + $0x28] sm:$0xff]  ;;  %448 = vmatpush.msra.mxu1 %v425_v14  ;;  %468 = vmatpush.msra.mxu2 %v426_v15  ;;  %v348_v19 = vld [vmem:[%s1153_s15 + $0x30] sm:$0xff]  ;;  %v349_v22 = vld [vmem:[%s1153_s15 + $0x38] sm:$0xff]  ;;  %s575_s1 = sshll.u32 %s341_s19, 4  ;;  %s577_s15 = sshll.u32 %s573_s22, 4  ;;  %s576_s1 = int_to_ptr.vmem [resolvable:$true] %s575_s1  ;;  %s578_s15 = int_to_ptr.hbm [resolvable:$true] %s577_s15 }
  0x3c   : > { %412 = vmatpush.msra.mxu0 %v388_v4  ;;  %v355_v17 = vadd.f32 %v354_v11, %v353_v10  ;;  %v360_v21 = vsel %vm350_vm0, %v347_v16, 0.0  ;;  %v362_v24 = vsel %vm350_vm0, %v348_v19, 0.0  ;;  %v364_v27 = vsel %vm350_vm0, %v349_v22, 0.0  ;;  %v423_v44 = vld [vmem:[#allocation7 + $0x20] sm:$0xff]  ;;  %v424_v45 = vld [vmem:[#allocation7 + $0x28] sm:$0xff]  ;;  %v421_v46 = vld [vmem:[#allocation7 + $0x10] sm:$0xff] }
  0x3d   : > { %vm369_vm1 = vcmp.ge.s32.totalorder %v368_v29, 1  ;;  %vm370_vm2 = vcmp.le.s32.totalorder %v368_v29, 6  ;;  %449 = vmatpush.msra.mxu1 %v423_v44  ;;  %469 = vmatpush.msra.mxu2 %v424_v45  ;;  %v422_v47 = vld [vmem:[#allocation7 + $0x18] sm:$0xff]  ;;  %v419_v48 = vld [vmem:[#allocation7] sm:$0xff]  ;;  %v420_v49 = vld [vmem:[#allocation7 + $0x8] sm:$0xff]  ;;  %s909_s12 = sshra.s32 %s578_s15, 4  ;;  %s910_s12 = int_to_ptr.hbm [resolvable:$true] %s909_s12 }
  0x3e   : > { %413 = vmatpush.msra.mxu0 %v387_v12  ;;  %v357_v20 = vadd.f32 %v356_v13, %v355_v17  ;;  %v798_v50 = vld [vmem:[%s1246_s2] ss:$0 sm:$0xff]  ;;  %v509_v0 = vld [vmem:[%s1249_s5 + $0x8] sm:$0xff]  ;;  %s911_s18 = scalar_lea.hbm %s910_s12, 1  ;;  %s915_s10 = scalar_lea.hbm %s1251_s7, 2 }
  0x3f   : > { %450 = vmatpush.msra.mxu1 %v421_v46  ;;  %470 = vmatpush.msra.mxu2 %v422_v47  ;;  %v427_v54 = vld [vmem:[%s1248_s4] sm:$0x3]  ;;  %p912_p1 = scmp.ne.s32.totalorder %s910_s12, %s911_s18  ;;  %p916_p11 = scmp.lt.s32.totalorder %s910_s12, %s1251_s7 }
  0x40   : > { %v359_v23 = vadd.f32 %v358_v18, %v357_v20  ;;  %v429_v55 = vperm.slane %v427_v54, 0  ;;  %v430_v58 = vperm.slane %v427_v54, 1  ;;  %v508_v61 = vld [vmem:[%s1249_s5] sm:$0xff]  ;;  %p917_p9 = scmp.lt.s32.totalorder %s915_s10, %s911_s18 }
  0x41   : > { %451 = vmatpush.msra.mxu1 %v419_v48  ;;  %471 = vmatpush.msra.mxu2 %v420_v49  ;;  %p913_p4 = pnand %p912_p1, %p1119_p5 }
  0x42   : > { %v361_v26 = vadd.f32 %v360_v21, %v359_v23  ;;  %p918_p2 = por %p917_p9, %p916_p11 }
  0x43   : > { %p914_p8 = pneg %p913_p4 }
  0x44   : > { %v363_v28 = vadd.f32 %v362_v24, %v361_v26 }
  0x45   : > { %p919_p10 = pnand %p918_p2, %p914_p8 }
  0x46   : > { %v365_v30 = vadd.f32 %v364_v27, %v363_v28 }
  0x48   : > { %v366_v31 = vmul.f32 0.125, %v365_v30 }
  0x4a   : > { %v371_v32 = vrot.slane %v366_v31, 7  ;;  %v372_v33 = vrot.slane %v366_v31, 1 }
  0x4c   : > { %v375_v34 = vsel %vm369_vm1, %v371_v32, -inf  ;;  %v379_v35 = vsel %vm370_vm2, %v372_v33, -inf  ;;  %v381_v36 = vsel %vm369_vm1, %v371_v32, 0.0  ;;  %v383_v37 = vsel %vm370_vm2, %v372_v33, 0.0 }
  0x4d   : > { %v376_v38 = vmax.f32 %v375_v34, %v366_v31  ;;  %v382_v39 = vadd.f32 %v381_v36, %v366_v31 }
  0x4f   : > { %v380_v40 = vmax.f32 %v376_v38, %v379_v35  ;;  %v384_v41 = vadd.f32 %v383_v37, %v382_v39 }
  0x51   : > { %v385_v42 = vmul.f32 0.33333334, %v384_v41 }
  0x53   : > { %v386_v43 = vadd.f32 %v385_v42, %v380_v40 }
  0x55   : > { %708 = vmatmul.msk.f32.vlgmr.msra.gmra.mxu0 %vm350_vm0, %v386_v43 }
  0xd2   : > { %v415_v51 = vpop.f32.mrf.mxu0 }
  0xd3   : > { %v416_v52 = vadd.f32 %v798_v50, %v415_v51 }
  0xd5   : > { %v418_v53 = vmax.f32 %v416_v52, 0.0 }
  0xd7   : > { %709 = vmatmul.msk.f32.vlgmr.msra.gmra.mxu1 %vm350_vm0, %v418_v53  ;;  %710 = vmatmul.msk.f32.vlgmr.msra.gmra.mxu2 %vm350_vm0, %v418_v53 }
 0x154   : > { %v453_v56 = vpop.f32.mrf.mxu1 }
 0x155   : > { %v454_v57 = vadd.f32 %v453_v56, %v429_v55 }
 0x157   : > { %799 = vtanh.f32 %v454_v57 }
 0x15a   : > { %v473_v59 = vpop.f32.mrf.mxu2 }
 0x15b   : > { %v474_v60 = vadd.f32 %v473_v59, %v430_v58 }
 0x15d   : > { %v800_v62 = vpop.eup %799  ;;  %532 = vmatpush.msra.mxu3 %v474_v60 }
 0x15e   : > { %v477_v63 = vmul.f32 1.442695, %v800_v62  ;;  %711 = vmatmul.msk.f32.vlgmr.msra.gmra.mxu3 %vm510_vm3, %v508_v61 }
 0x160   : > { %801 = vpow2.f32 %v477_v63 }
 0x166   : > { %v802_v1 = vpop.eup %801  ;;  %712 = vmatmul.msk.f32.gmra.mxu3 %vm510_vm3, %v509_v0 }
 0x167   : > { %v479_v2 = vrot.slane %v802_v1, 4 }
 0x169   : > { %v480_v3 = vadd.f32 %v802_v1, %v479_v2 }
 0x16b   : > { %v481_v4 = vrot.slane %v480_v3, 2 }
 0x16d   : > { %v482_v5 = vadd.f32 %v481_v4, %v480_v3 }
 0x16f   : > { %v483_v6 = vrot.slane %v482_v5, 1 }
 0x171   : > { %v484_v7 = vadd.f32 %v483_v6, %v482_v5 }
 0x173   : > { %803 = vrcp.f32 %v484_v7  ;;  %v496_v11 = vand.u32 2147483648, %v484_v7  ;;  %v494_v13 = vand.u32 2147483647, %v484_v7  ;;  %vm490_vm5 = vweird.f32 %v484_v7 }
 0x175   : > { %v497_v15 = vor.u32 1.1754944e-38, %v496_v11  ;;  %vm495_vm7 = vcmp.eq.f32.partialorder %v494_v13, 8.507059e+37 }
 0x179   : > { %v804_v8 = vpop.eup %803 }
 0x17a   : > { %v486_v9 = vmul.f32 %v804_v8, %v484_v7  ;;  %vm491_vm4 = vweird.f32 %v804_v8 }
 0x17b   : > { %vm492_vm6 = vmor %vm490_vm5, %vm491_vm4 }
 0x17c   : > { %v487_v10 = vsub.f32 1.0, %v486_v9 }
 0x17e   : > { %v488_v12 = vmul.f32 %v804_v8, %v487_v10 }
 0x180   : > { %v489_v14 = vadd.f32 %v804_v8, %v488_v12 }
 0x182   : > { %v493_v16 = vsel %vm492_vm6, %v804_v8, %v489_v14 }
 0x183   : > { %v498_v17 = vsel %vm495_vm7, %v497_v15, %v493_v16 }
 0x184   : > { %v499_v18 = vmul.f32 %v802_v1, %v498_v17 }
 0x186   : > { %v500_v19 = vmul.f32 %v499_v18, %v474_v60 }
 0x188   : > { %v501_v20 = vrot.slane %v500_v19, 4 }
 0x18a   : > { %v502_v21 = vadd.f32 %v501_v20, %v500_v19 }
 0x18c   : > { %v503_v22 = vrot.slane %v502_v21, 2 }
 0x18e   : > { %v504_v23 = vadd.f32 %v503_v22, %v502_v21 }
 0x190   : > { %v505_v24 = vrot.slane %v504_v23, 1 }
 0x192   : > { %v506_v25 = vadd.f32 %v505_v24, %v504_v23 }
 0x194   : > { %507 = vst [vmem:[%s341_s19] sm:$0x1] %v506_v25 }
 0x195   : > { %922 = shalt.err (!%p919_p10)
}
 0x196   : > { %731 = dma.vmem_to_hbm [thread:$0]  (%p1119_p5), %s576_s1, 16, %s578_s15, %s548_s30  }
 0x197   : > { %s707_s21 = sshll.u32 %s1149_s16, 4  ;;  %s719_s14 = sshll.u32 %s1068_s28, 4 }
 0x198   : > { %s558_s23 = scalar_lea.hbm %s1250_s6, %s719_s14  ;;  %s335_s9 = scalar_lea.vmem [#allocation8], %s707_s21 }
 0x199   : > { %s559_s12 = sshll.u32 %s335_s9, 4  ;;  %s561_s18 = sshll.u32 %s558_s23, 4  ;;  %s560_s12 = int_to_ptr.vmem [resolvable:$true] %s559_s12  ;;  %s562_s18 = int_to_ptr.hbm [resolvable:$true] %s561_s18 }
 0x19a   : > { %s543_s10 = scalar_lea.sflag [#allocation4], %s1149_s16  ;;  %s937_s17 = sshra.s32 %s562_s18, 4  ;;  %s938_s17 = int_to_ptr.hbm [resolvable:$true] %s937_s17 }
 0x19b   : > { %s939_s1 = scalar_lea.hbm %s938_s17, 16  ;;  %s943_s30 = scalar_lea.hbm %s1250_s6, 32 }
 0x19c   : > { %p940_p12 = scmp.ne.s32.totalorder %s938_s17, %s939_s1  ;;  %p944_p3 = scmp.lt.s32.totalorder %s938_s17, %s1250_s6 }
 0x19d   : > { %p945_p7 = scmp.lt.s32.totalorder %s943_s30, %s939_s1 }
 0x19e   : > { %p941_p13 = pnand %p940_p12, %p1119_p5 }
 0x19f   : > { %p946_p1 = por %p945_p7, %p944_p3 }
 0x1a0   : > { %p942_p0 = pneg %p941_p13 }
 0x1a2   : > { %p947_p4 = pnand %p946_p1, %p942_p0 }
 0x1e1   : > { %v534_v26 = vpop.f32.mrf.mxu3 }
 0x1e2   : > { %540 = vst [vmem:[%s335_s9] sm:$0xff] %v534_v26 }
 0x1e9   : > { %v537_v27 = vpop.f32.mrf.mxu3 }
 0x1ea   : > { %541 = vst [vmem:[%s335_s9 + $0x8] sm:$0xff] %v537_v27 }
 0x1eb   : > { %950 = shalt.err (!%p947_p4)
}
 0x1ec   : > { %s1005_s16 = smov 128   ;;  %s1006_s14 = smov 8  }
 0x1ed   : > { %730 = dma.vmem_to_hbm [thread:$0]  (%p1119_p5), %s560_s12, 256, %s562_s18, %s543_s10, %s1005_s16, %s1005_s16, %s1006_s14  }
 0x1ee PF: > { %s589_s22 = sand.u32 1, %s985_s24   ;;  %p1263_p8 = scmp.ge.s32.totalorder %s997_s27, 2 }
 0x1ef   : > { %s590_s19 = scalar_lea.sflag [#allocation4], %s589_s22 }
 0x1f0   : > { %p746_p11 = pnand %p1263_p8, %p1082_p6 }
 0x1f2   : > { %p747_p9 = pneg %p746_p11 }
 0x1f4   : > { %976 = dma.done.wait (%p747_p9), %s590_s19, 256  }
 0x1f5   : > { %978 = vsyncadd (%p747_p9), %s590_s19, 4294967040  ;;  %s600_s23 = scalar_lea.sflag [#allocation10], %s589_s22 }
 0x1f6   : > { %980 = dma.done.wait (%p747_p9), %s600_s23, 16  }
 0x1f7   : > { %982 = vsyncadd (%p747_p9), %s600_s23, 4294967280  ;;  %p25_p5 = scmp.ge.s32.totalorder %s1106_s29, 4   ;;  %s1264_s24 = smov %s989_s25 }
 0x1f8   : > { %s1265_s25 = smov %s993_s26  ;;  %s1266_s26 = smov %s1115_s13 }
 0x1f9   : > { %s1267_s27 = smov %s1106_s29  ;;  %27 = sbr.rel (!%p25_p5) target bundleno = 10 (0xa), region = 114 }
 0x1fe   :  { %605 = vsyncpa [#allocation3], 1 }
 0x1ff   :  { %607 = vsyncpa [#allocation3 + $0x1], 1 }
 0x200   :  { %608 = vsyncpa [#allocation6], 1 }
 0x201   :  { %609 = vsyncpa [#allocation4], 1 }
 0x202   :  { %611 = vsyncpa [#allocation4 + $0x1], 1 }
 0x203   :  { %612 = vsyncpa [#allocation10], 1 }
 0x204   :  { %614 = vsyncpa [#allocation10 + $0x1], 1 }

</bundles_post_ra>
